<compile_context>
chip_gen: v5e
topology: v5e:2x2
jax: 0.10.0
libtpu: 0.0.40
codegen_flags: <defaults>
</compile_context>

<pallas_src>
import jax
import jax.numpy as jnp
from jax.experimental import pallas as pl
from jax.experimental.pallas import tpu as pltpu

W_LOSS = 0.9      # weight on throughput term (from the PyTorch module)
TX_POWER = 1.0    # synthetic transmit power
NOISE = 1.0       # synthetic noise power
_LANES = 128
_LN2 = 0.6931471805599453


def _round_up(x, m):
    return ((x + m - 1) // m) * m


def _make_kernel(tr, valid_rows, ragged):
    """Kernel for one (tr, 128) lane-dense tile of flattened (batch*N) data."""
    c_thr = -W_LOSS / _LN2           # folds the 1/ln2 of log2 into the weight
    c_ent = -(1.0 - W_LOSS) / _LN2

    def kernel(h_ref, f_ref, a_ref, out_ref):
        h = h_ref[...]               # gathered G rows (transmitting MU)
        f = f_ref[...]               # BS -> BD channel
        a = a_ref[...]               # user-association probabilities

        casc = h * f                                   # cascaded BS->BD->MU channel
        snr = (TX_POWER / NOISE) * (casc * casc)
        thr = a * jnp.log(1.0 + snr)                   # natural log; /ln2 folded

        # Entropy term, guarded so zero-padded entries give 0, not 0*(-inf)=NaN.
        safe_a = jnp.where(a > 0.0, a, 1.0)
        ent = jnp.where(a > 0.0, a * jnp.log(safe_a), 0.0)

        contrib = c_thr * thr + c_ent * ent

        if ragged:
            # Last grid block extends past the array: zero out-of-bounds rows.
            i = pl.program_id(0)
            gid = i * tr + jax.lax.broadcasted_iota(jnp.int32, (tr, _LANES), 0)
            contrib = jnp.where(gid < valid_rows, contrib, 0.0)

        # 8-sublane-aligned partial sum -> unmasked (8,128) store per block.
        out_ref[...] = contrib.reshape(tr // 8, 8, _LANES).sum(axis=0)

    return kernel


def user_association_loss(G, f, t, as_vect, *, block_rows=4096):
    """G: [B,M,N] f32, f: [B,N,1] f32, t: [B,M,1] bool one-hot, as_vect: [B,N] f32."""
    B, M, N = G.shape
    total = B * N

    G = G.astype(jnp.float32)

    # Row gather: t is one-hot over M, so only row mu_idx[b] of G[b] matters.
    # Reads ~B*N elements of G instead of B*M*N.  Zero the row if no MU is
    # active so behavior matches the t^T G reference for malformed schedulers.
    t2d = t.reshape(B, M)
    mu_idx = jnp.argmax(t2d.astype(jnp.int32), axis=1)
    any_tx = jnp.any(t2d, axis=1).astype(jnp.float32)             # [B]
    h_rows = jnp.take_along_axis(G, mu_idx[:, None, None], axis=1)  # [B,1,N]
    h_flat = (h_rows * any_tx[:, None, None]).reshape(total)
    f_flat = f.astype(jnp.float32).reshape(total)
    a_flat = as_vect.astype(jnp.float32).reshape(total)

    # Lane-dense (rows,128) view.  When total % 1024 == 0 (common production
    # case) this is a free reshape (no HBM copy); otherwise pad minimally to
    # the next (8,128)-aligned size (reshape itself needs an exact multiple).
    padded = _round_up(total, 8 * _LANES)
    rows = padded // _LANES                        # multiple of 8, >= 8

    def as2d(x):
        if padded != total:
            x = jnp.pad(x, (0, padded - total))
        return x.reshape(rows, _LANES)

    h2, f2, a2 = as2d(h_flat), as2d(f_flat), as2d(a_flat)

    # Tiling: big tiles (low per-step overhead), rebalanced so padding per
    # block stays < 8 rows; force >= 2 blocks when there is enough work so the
    # "parallel" axis gives v7x's second TensorCore something to do.
    nb = pl.cdiv(rows, block_rows)
    if nb == 1 and rows >= 64:
        nb = 2
    tr = _round_up(pl.cdiv(rows, nb), 8)
    nb = pl.cdiv(rows, tr)
    ragged = (nb * tr != rows)                     # last block extends past array

    # 3 inputs x 2 pipeline buffers x tile, plus headroom for the tiny output.
    tile_bytes = tr * _LANES * 4
    vmem_limit = int(min(max(3 * 2 * tile_bytes + (4 << 20), 16 << 20), 64 << 20))

    partials = pl.pallas_call(
        _make_kernel(tr, rows, ragged),
        out_shape=jax.ShapeDtypeStruct((nb * 8, _LANES), jnp.float32),
        grid=(nb,),
        in_specs=[
            pl.BlockSpec((tr, _LANES), lambda i: (i, 0)),
            pl.BlockSpec((tr, _LANES), lambda i: (i, 0)),
            pl.BlockSpec((tr, _LANES), lambda i: (i, 0)),
        ],
        # Each grid step owns its own aligned (8,128) output block -> no RMW
        # chain, no cross-core false sharing; axis can split across cores.
        out_specs=pl.BlockSpec((8, _LANES), lambda i: (i, 0)),
        compiler_params=pltpu.CompilerParams(
            dimension_semantics=("parallel",),
            vmem_limit_bytes=vmem_limit),
    )(h2, f2, a2)

    # Tiny final reduction (nb*8 x 128 values) in the wrapper.
    return jnp.sum(partials)


def _reference_loss(G, f, t, as_vect):
    # Pure-JAX reference with the same assumed calculate_throughput.
    tf = t.astype(jnp.float32)
    h = jnp.einsum("bmn,bm->bn", G, tf[..., 0])          # [B, N]
    casc = h * f[..., 0]                                  # [B, N]
    snr = (TX_POWER / NOISE) * casc * casc
    thr = as_vect * jnp.log2(1.0 + snr)
    return (-W_LOSS * jnp.sum(thr)
            - (1.0 - W_LOSS) * jnp.sum(as_vect * jnp.log2(as_vect)))


def _make_inputs(key, B, M, N):
    kg, kf, kt, ka = jax.random.split(key, 4)
    G = jax.random.normal(kg, (B, M, N), dtype=jnp.float32)
    f = jax.random.normal(kf, (B, N, 1), dtype=jnp.float32)
    mu_idx = jax.random.randint(kt, (B,), 0, M)
    t = (jax.nn.one_hot(mu_idx, M) > 0.5).reshape(B, M, 1)
    as_vect = jax.nn.softmax(
        jax.random.normal(ka, (B, N), dtype=jnp.float32), axis=-1)
    return G, f, t, as_vect


if __name__ == "__main__":
    key = jax.random.PRNGKey(0)

    # Small demo shape (padded tiny slab, single block).
    G, f, t, as_vect = _make_inputs(key, B=2, M=8, N=16)
    loss = user_association_loss(G, f, t, as_vect)
    jax.block_until_ready(loss)
    ref = _reference_loss(G, f, t, as_vect)
    assert jnp.allclose(loss, ref, rtol=2e-4, atol=1e-4), (loss, ref)

    # Second shape exercises the zero-copy reshape path (B*N % 1024 == 0),
    # the forced 2-block parallel split, and the ragged last-block mask
    # (rows=72, tr=40, nb=2).
    G2, f2, t2, a2 = _make_inputs(jax.random.PRNGKey(1), B=9, M=4, N=1024)
    loss2 = user_association_loss(G2, f2, t2, a2)
    jax.block_until_ready(loss2)
    ref2 = _reference_loss(G2, f2, t2, a2)
    assert jnp.allclose(loss2, ref2, rtol=2e-4, atol=1e-3), (loss2, ref2)

    print("KERNEL_OK")
</pallas_src>

<mosaic_0001>
module attributes {stable_mosaic.version = 11 : i64} {
  func.func @kernel(%arg0: i32, %arg1: memref<8x128xf32, #tpu.memory_space<vmem>>, %arg2: memref<8x128xf32, #tpu.memory_space<vmem>>, %arg3: memref<8x128xf32, #tpu.memory_space<vmem>>, %arg4: memref<8x128xf32, #tpu.memory_space<vmem>>) attributes {dimension_semantics = [#tpu.dimension_semantics<parallel>], iteration_bounds = array<i64: 1>, scalar_prefetch = 0 : i64, scratch_operands = 0 : i64, tpu.core_type = #tpu.core_type<tc>, window_params = [{transform_indices = @transform_0, window_bounds = array<i64: 8, 128>}, {transform_indices = @transform_1, window_bounds = array<i64: 8, 128>}, {transform_indices = @transform_2, window_bounds = array<i64: 8, 128>}, {transform_indices = @transform_3, window_bounds = array<i64: 8, 128>}]} {
    %c0 = arith.constant 0 : index
    %c0_0 = arith.constant 0 : index
    %0 = vector.load %arg1[%c0, %c0_0] : memref<8x128xf32, #tpu.memory_space<vmem>>, vector<8x128xf32>
    %c0_1 = arith.constant 0 : index
    %c0_2 = arith.constant 0 : index
    %1 = vector.load %arg2[%c0_1, %c0_2] : memref<8x128xf32, #tpu.memory_space<vmem>>, vector<8x128xf32>
    %c0_3 = arith.constant 0 : index
    %c0_4 = arith.constant 0 : index
    %2 = vector.load %arg3[%c0_3, %c0_4] : memref<8x128xf32, #tpu.memory_space<vmem>>, vector<8x128xf32>
    %3 = arith.mulf %0, %1 : vector<8x128xf32>
    %4 = arith.mulf %3, %3 : vector<8x128xf32>
    %cst = arith.constant 1.000000e+00 : f32
    %5 = vector.broadcast %cst : f32 to vector<8x128xf32>
    %6 = arith.mulf %5, %4 : vector<8x128xf32>
    %cst_5 = arith.constant 1.000000e+00 : f32
    %7 = vector.broadcast %cst_5 : f32 to vector<8x128xf32>
    %8 = arith.addf %7, %6 : vector<8x128xf32>
    %9 = math.log %8 : vector<8x128xf32>
    %10 = arith.mulf %2, %9 : vector<8x128xf32>
    %cst_6 = arith.constant 0.000000e+00 : f32
    %11 = vector.broadcast %cst_6 : f32 to vector<8x128xf32>
    %12 = arith.cmpf ogt, %2, %11 : vector<8x128xf32>
    %cst_7 = arith.constant 1.000000e+00 : f32
    %13 = vector.broadcast %cst_7 : f32 to vector<8x128xf32>
    %14 = arith.select %12, %2, %13 : vector<8x128xi1>, vector<8x128xf32>
    %cst_8 = arith.constant 0.000000e+00 : f32
    %15 = vector.broadcast %cst_8 : f32 to vector<8x128xf32>
    %16 = arith.cmpf ogt, %2, %15 : vector<8x128xf32>
    %17 = math.log %14 : vector<8x128xf32>
    %18 = arith.mulf %2, %17 : vector<8x128xf32>
    %cst_9 = arith.constant 0.000000e+00 : f32
    %19 = vector.broadcast %cst_9 : f32 to vector<8x128xf32>
    %20 = arith.select %16, %18, %19 : vector<8x128xi1>, vector<8x128xf32>
    %cst_10 = arith.constant -1.29842556 : f32
    %21 = vector.broadcast %cst_10 : f32 to vector<8x128xf32>
    %22 = arith.mulf %21, %10 : vector<8x128xf32>
    %cst_11 = arith.constant -0.144269511 : f32
    %23 = vector.broadcast %cst_11 : f32 to vector<8x128xf32>
    %24 = arith.mulf %23, %20 : vector<8x128xf32>
    %25 = arith.addf %22, %24 : vector<8x128xf32>
    %26 = vector.shape_cast %25 : vector<8x128xf32> to vector<1x8x128xf32>
    %cst_12 = arith.constant dense<0.000000e+00> : vector<8x128xf32>
    %27 = vector.multi_reduction <add>, %26, %cst_12 [0] : vector<1x8x128xf32> to vector<8x128xf32>
    %c0_13 = arith.constant 0 : index
    %c0_14 = arith.constant 0 : index
    %28 = vector.load %arg4[%c0_13, %c0_14] : memref<8x128xf32, #tpu.memory_space<vmem>>, vector<8x128xf32>
    tpu.vector_store %arg4[%c0_13, %c0_14], %27 {strides = array<i32>} : memref<8x128xf32, #tpu.memory_space<vmem>>, vector<8x128xf32>,
    return
  }
  func.func @transform_0(%arg0: i32) -> (i32, i32) {
    %c0_i32 = arith.constant 0 : i32
    %c0_i32_0 = arith.constant 0 : i32
    return %arg0, %c0_i32 : i32, i32
  }
  func.func @transform_1(%arg0: i32) -> (i32, i32) {
    %c0_i32 = arith.constant 0 : i32
    %c0_i32_0 = arith.constant 0 : i32
    return %arg0, %c0_i32 : i32, i32
  }
  func.func @transform_2(%arg0: i32) -> (i32, i32) {
    %c0_i32 = arith.constant 0 : i32
    %c0_i32_0 = arith.constant 0 : i32
    return %arg0, %c0_i32 : i32, i32
  }
  func.func @transform_3(%arg0: i32) -> (i32, i32) {
    %c0_i32 = arith.constant 0 : i32
    %c0_i32_0 = arith.constant 0 : i32
    return %arg0, %c0_i32 : i32, i32
  }
}

</mosaic_0001>

<bundles_post_ra>
// kernel: tpu_custom_call.1
= control target key start
LH: loop header
LB: loop body
LE: loop exit
PB: predicated region body
PF: predicated region fallthrough
CT: control target
= control target key end

     0   :  { %8 = vsyncpa [#allocation3], 0  ;;  %s240_s0 = inlined_call_operand.hbm [shape: f32[8,128], index: 0, kind: input, shape index: {}]   ;;  %s241_s1 = inlined_call_operand.hbm [shape: f32[8,128], index: 1, kind: input, shape index: {}]   ;;  %s242_s2 = inlined_call_operand.hbm [shape: f32[8,128], index: 2, kind: input, shape index: {}]   ;;  %s243_s3 = inlined_call_operand.hbm [shape: f32[8,128], index: 3, kind: output, shape index: {}]  }
   0x1   :  { %9 = vsyncpa [#allocation6], 0  ;;  %s27_s14 = sshll.u32 %s241_s1, 4  ;;  %s28_s14 = int_to_ptr.hbm [resolvable:$true] %s27_s14 }
   0x2   :  { %10 = vsyncpa [#allocation4], 0  ;;  %s204_s15 = smov [#allocation5]   ;;  %s16_s19 = sshll.u32 %s240_s0, 4  ;;  %s17_s19 = int_to_ptr.hbm [resolvable:$true] %s16_s19 }
   0x3   :  { %s29_s16 = sshll.u32 %s204_s15, 4  ;;  %s205_s20 = smov [#allocation2]   ;;  %s30_s16 = int_to_ptr.vmem [resolvable:$true] %s29_s16 }
   0x4   :  { %32 = dma.hbm_to_vmem [thread:$0]  %s28_s14, 128, %s30_s16, [#allocation6]  }
   0x5   :  { %s18_s21 = sshll.u32 %s205_s20, 4  ;;  %s38_s24 = sshll.u32 %s242_s2, 4  ;;  %s19_s21 = int_to_ptr.vmem [resolvable:$true] %s18_s21  ;;  %s39_s24 = int_to_ptr.hbm [resolvable:$true] %s38_s24 }
   0x6   :  { %21 = dma.hbm_to_vmem [thread:$0]  %s17_s19, 128, %s19_s21, [#allocation3]  }
   0x7   :  { %s206_s1 = smov [#allocation7]  }
   0x8   :  { %s40_s25 = sshll.u32 %s206_s1, 4  ;;  %s41_s25 = int_to_ptr.vmem [resolvable:$true] %s40_s25 }
   0x9   :  { %43 = dma.hbm_to_vmem [thread:$0]  %s39_s24, 128, %s41_s25, [#allocation6]  }
   0xa   :  { %198 = dma.done.wait [#allocation3], 128  }
   0xb   :  { %199 = vsyncadd [#allocation3], 4294967168 }
   0xc   :  { %200 = dma.done.wait [#allocation6], 256  }
   0xd   :  { %201 = vsyncadd [#allocation6], 4294967040  ;;  %v56_v0 = vld [vmem:[#allocation2] sm:$0xff]  ;;  %v57_v1 = vld [vmem:[#allocation5] sm:$0xff]  ;;  %s207_s0 = smov [#allocation8]   ;;  %s83_s28 = sshll.u32 %s243_s3, 4  ;;  %s84_s28 = int_to_ptr.hbm [resolvable:$true] %s83_s28 }
   0xe   :  { %v58_v2 = vld [vmem:[#allocation7] sm:$0xff]  ;;  %v59_v3 = vmul.f32 %v57_v1, %v56_v0  ;;  %s81_s2 = sshll.u32 %s207_s0, 4  ;;  %s82_s2 = int_to_ptr.vmem [resolvable:$true] %s81_s2 }
   0xf   :  { %vm65_vm0 = vcmp.gt.f32.partialorder %v58_v2, 0.0 }
  0x10   :  { %v66_v4 = vsel %vm65_vm0, %v58_v2, 1.0  ;;  %v60_v5 = vmul.f32 %v59_v3, %v59_v3 }
  0x11   :  { %98 = vlog2.f32 %v66_v4 }
  0x12   :  { %v61_v6 = vadd.f32 1.0, %v60_v5 }
  0x14   :  { %100 = vlog2.f32 %v61_v6 }
  0x17   :  { %v99_v7 = vpop.eup %98 }
  0x18   :  { %v68_v8 = vmul.f32 0.6931472, %v99_v7 }
  0x1a   :  { %v69_v9 = vmul.f32 %v68_v8, %v58_v2  ;;  %v101_v10 = vpop.eup %100 }
  0x1b   :  { %v63_v11 = vmul.f32 0.6931472, %v101_v10 }
  0x1c   :  { %v70_v12 = vsel %vm65_vm0, %v69_v9, 0.0 }
  0x1d   :  { %v64_v13 = vmul.f32 %v63_v11, %v58_v2  ;;  %v72_v14 = vmul.f32 -0.14426951, %v70_v12 }
  0x1f   :  { %v71_v15 = vmul.f32 -1.2984256, %v64_v13 }
  0x21   :  { %v73_v16 = vadd.f32 %v72_v14, %v71_v15 }
  0x23   :  { %75 = vst [vmem:[#allocation8] sm:$0xff] %v73_v16 }
  0x24   :  { %86 = dma.vmem_to_hbm [thread:$0]  %s82_s2, 128, %s84_s28, [#allocation4]  }
  0x25   :  { %202 = dma.done.wait [#allocation4], 128  }
  0x26   :  { %203 = vsyncadd [#allocation4], 4294967168 }
  0x27   :  { %91 = vsyncpa [#allocation3], 1 }
  0x28   :  { %92 = vsyncpa [#allocation6], 1 }
  0x29   :  { %93 = vsyncpa [#allocation4], 1 }

</bundles_post_ra>
